<compile_context>
chip_gen: v5e
topology: v5e:2x2
jax: 0.10.0
libtpu: 0.0.40
codegen_flags: <defaults>
</compile_context>

<pallas_src>
import jax
import jax.numpy as jnp
from jax.experimental import pallas as pl
from jax.experimental.pallas import tpu as pltpu

# Unused-in-forward hyper-parameters of the original module (kept for fidelity).
N_FWD, N_BWD, N_OFFSET = 5, 5, 0


def _fast_recip(x):
    """EUP approximate reciprocal + one Newton-Raphson refinement.

    approx=True lowers to the EUP vrcp (free co-issue with VALU work); the single NR step
    (2 mul + 1 sub on a tiny [Bt, 1] vector) restores near-f32 accuracy.
    """
    r = pl.reciprocal(x, approx=True)
    return r * (2.0 - x * r)


def _dnnhmm_kernel(x_ref, w1_ref, b1_ref, w2_ref, b2_ref, a_ref, prior_ref, out_ref):
    # x_ref:   [Bt, F]   last spectrogram frame only (selected in the wrapper)
    # w1/b1:   [F, H] / [1, H]     w2/b2: [H, C] / [1, C]
    # a_ref:   [C, C] HMM transition matrix (rows sum to 1)
    # prior:   [Bt, C] prob-filter state
    # out_ref: [Bt, 2*C] packed slab: [:, :C] = prob, [:, C:] = post
    x = x_ref[...]                                    # already f32; no cast

    # ---- classifier: 2-layer MLP + softmax on the last frame (2-D matmuls on the MXU) ----
    h = jnp.dot(x, w1_ref[...], preferred_element_type=jnp.float32) + b1_ref[...]
    h = jnp.maximum(h, 0.0)
    logits = jnp.dot(h, w2_ref[...], preferred_element_type=jnp.float32) + b2_ref[...]

    logits = logits - jnp.max(logits, axis=-1, keepdims=True)
    e = jnp.exp(logits)
    prob = e * _fast_recip(jnp.sum(e, axis=-1, keepdims=True))        # [Bt, C]

    # ---- probfilter: one HMM forward-filtering step ----
    pred = jnp.dot(prior_ref[...], a_ref[...], preferred_element_type=jnp.float32)
    joint = pred * prob
    post = joint * _fast_recip(jnp.sum(joint, axis=-1, keepdims=True))

    # single packed store (one lane-contiguous slab instead of two tiny outputs)
    out_ref[...] = jnp.concatenate([prob, post], axis=-1)


def dnnhmm_filter(pspec, w1, b1, w2, b2, trans, prior):
    B, T, F = pspec.shape
    H = w1.shape[1]
    C = w2.shape[1]

    # Only probs[:, -1, :] is ever used and the classifier is frame-wise, so select the
    # last frame before the kernel (layout plumbing): kernel input is [B, F], not [B, T, F].
    x_last = pspec[:, T - 1, :]

    # Batch tiling: full batch per step at toy sizes; capped at 128 rows so double-buffered
    # inputs stay far under the v7x 32 MiB scoped-VMEM default even at real scale.
    block_b = B if B <= 128 else 128
    grid_b = pl.cdiv(B, block_b)

    out = pl.pallas_call(
        _dnnhmm_kernel,
        out_shape=jax.ShapeDtypeStruct((B, 2 * C), jnp.float32),
        grid=(grid_b,),
        in_specs=[
            pl.BlockSpec((block_b, F), lambda i: (i, 0)),   # last frame, batch-tiled
            pl.BlockSpec((F, H), lambda i: (0, 0)),
            pl.BlockSpec((1, H), lambda i: (0, 0)),
            pl.BlockSpec((H, C), lambda i: (0, 0)),
            pl.BlockSpec((1, C), lambda i: (0, 0)),
            pl.BlockSpec((C, C), lambda i: (0, 0)),
            pl.BlockSpec((block_b, C), lambda i: (i, 0)),   # prior, batch-tiled
        ],
        out_specs=pl.BlockSpec((block_b, 2 * C), lambda i: (i, 0)),
        compiler_params=pltpu.CompilerParams(
            dimension_semantics=("parallel",)),
    )(x_last, w1, b1, w2, b2, trans, prior)

    prob = out[:, :C]
    post = out[:, C:]
    return prob, post


def _reference(pspec, w1, b1, w2, b2, trans, prior):
    # Reference keeps the original structure: classify EVERY frame, then take [:, -1].
    h = jnp.maximum(jnp.einsum("btf,fh->bth", pspec, w1) + b1[0], 0.0)
    logits = jnp.einsum("bth,hc->btc", h, w2) + b2[0]
    probs = jax.nn.softmax(logits, axis=-1)
    prob = probs[:, -1, :]
    pred = prior @ trans
    joint = pred * prob
    post = joint / jnp.sum(joint, axis=-1, keepdims=True)
    return prob, post


if __name__ == "__main__":
    B, T, F, H, C = 2, 8, 32, 32, 4

    key = jax.random.PRNGKey(0)
    k_x, k_w1, k_b1, k_w2, k_b2, k_a = jax.random.split(key, 6)

    # deterministic synthetic inputs / parameters
    pspec = jax.random.normal(k_x, (B, T, F), dtype=jnp.float32)
    w1 = jax.random.normal(k_w1, (F, H), dtype=jnp.float32) * 0.1
    b1 = jax.random.normal(k_b1, (1, H), dtype=jnp.float32) * 0.01
    w2 = jax.random.normal(k_w2, (H, C), dtype=jnp.float32) * 0.1
    b2 = jax.random.normal(k_b2, (1, C), dtype=jnp.float32) * 0.01
    # HMM transition matrix: sticky diagonal, rows sum to 1
    trans = 0.8 * jnp.eye(C, dtype=jnp.float32) + 0.2 / C * jnp.ones((C, C), jnp.float32)
    # prior state of the prob-filter (uniform; the stateful reset() maps to re-creating this)
    # TODO(synk): probfilter.reset() / .to('cpu') statefulness has no Pallas equivalent;
    # the filter state is threaded explicitly as the `prior` argument.
    prior = jnp.full((B, C), 1.0 / C, dtype=jnp.float32)

    prob, post = dnnhmm_filter(pspec, w1, b1, w2, b2, trans, prior)
    jax.block_until_ready((prob, post))

    prob_ref, post_ref = _reference(pspec, w1, b1, w2, b2, trans, prior)
    # Tolerance accommodates the EUP approximate reciprocal (NR-refined; actual error is
    # typically <1e-5, the 1e-3 bound is conservative for probabilities in [0, 1]).
    assert jnp.allclose(prob, prob_ref, atol=1e-3, rtol=1e-3)
    assert jnp.allclose(post, post_ref, atol=1e-3, rtol=1e-3)
    assert prob.shape == (B, C) and post.shape == (B, C)

    print("KERNEL_OK")
</pallas_src>

<mosaic_0001>
module attributes {stable_mosaic.version = 11 : i64} {
  func.func @_dnnhmm_kernel(%arg0: i32, %arg1: memref<2x32xf32, #tpu.memory_space<vmem>>, %arg2: memref<32x32xf32, #tpu.memory_space<vmem>>, %arg3: memref<1x32xf32, #tpu.memory_space<vmem>>, %arg4: memref<32x4xf32, #tpu.memory_space<vmem>>, %arg5: memref<1x4xf32, #tpu.memory_space<vmem>>, %arg6: memref<4x4xf32, #tpu.memory_space<vmem>>, %arg7: memref<2x4xf32, #tpu.memory_space<vmem>>, %arg8: memref<2x8xf32, #tpu.memory_space<vmem>>) attributes {dimension_semantics = [#tpu.dimension_semantics<parallel>], iteration_bounds = array<i64: 1>, scalar_prefetch = 0 : i64, scratch_operands = 0 : i64, tpu.core_type = #tpu.core_type<tc>, window_params = [{transform_indices = @transform_0, window_bounds = array<i64: 2, 32>}, {pipeline_mode = #tpu.pipeline_mode<synchronous>, transform_indices = @transform_1, window_bounds = array<i64: 32, 32>}, {pipeline_mode = #tpu.pipeline_mode<synchronous>, transform_indices = @transform_2, window_bounds = array<i64: 1, 32>}, {pipeline_mode = #tpu.pipeline_mode<synchronous>, transform_indices = @transform_3, window_bounds = array<i64: 32, 4>}, {pipeline_mode = #tpu.pipeline_mode<synchronous>, transform_indices = @transform_4, window_bounds = array<i64: 1, 4>}, {pipeline_mode = #tpu.pipeline_mode<synchronous>, transform_indices = @transform_5, window_bounds = array<i64: 4, 4>}, {transform_indices = @transform_6, window_bounds = array<i64: 2, 4>}, {transform_indices = @transform_7, window_bounds = array<i64: 2, 8>}]} {
    %c0 = arith.constant 0 : index
    %c0_0 = arith.constant 0 : index
    %0 = vector.load %arg1[%c0, %c0_0] : memref<2x32xf32, #tpu.memory_space<vmem>>, vector<2x32xf32>
    %c0_1 = arith.constant 0 : index
    %c0_2 = arith.constant 0 : index
    %1 = vector.load %arg2[%c0_1, %c0_2] : memref<32x32xf32, #tpu.memory_space<vmem>>, vector<32x32xf32>
    %cst = arith.constant dense<0.000000e+00> : vector<2x32xf32>
    %2 = tpu.matmul %0, %1, %cst {dimension_numbers = #tpu.dot_dimension_numbers<[1], [0], [0], [1], [0, 0, 1, 1], [], []>} : vector<2x32xf32>, vector<32x32xf32>, vector<2x32xf32> -> vector<2x32xf32>
    %c0_3 = arith.constant 0 : index
    %c0_4 = arith.constant 0 : index
    %3 = vector.load %arg3[%c0_3, %c0_4] : memref<1x32xf32, #tpu.memory_space<vmem>>, vector<1x32xf32>
    %4 = vector.broadcast %3 : vector<1x32xf32> to vector<2x32xf32>
    %5 = arith.addf %2, %4 : vector<2x32xf32>
    %cst_5 = arith.constant 0.000000e+00 : f32
    %6 = vector.broadcast %cst_5 : f32 to vector<2x32xf32>
    %7 = arith.maximumf %5, %6 : vector<2x32xf32>
    %c0_6 = arith.constant 0 : index
    %c0_7 = arith.constant 0 : index
    %8 = vector.load %arg4[%c0_6, %c0_7] : memref<32x4xf32, #tpu.memory_space<vmem>>, vector<32x4xf32>
    %cst_8 = arith.constant dense<0.000000e+00> : vector<2x4xf32>
    %9 = tpu.matmul %7, %8, %cst_8 {dimension_numbers = #tpu.dot_dimension_numbers<[1], [0], [0], [1], [0, 0, 1, 1], [], []>} : vector<2x32xf32>, vector<32x4xf32>, vector<2x4xf32> -> vector<2x4xf32>
    %c0_9 = arith.constant 0 : index
    %c0_10 = arith.constant 0 : index
    %10 = vector.load %arg5[%c0_9, %c0_10] : memref<1x4xf32, #tpu.memory_space<vmem>>, vector<1x4xf32>
    %11 = vector.broadcast %10 : vector<1x4xf32> to vector<2x4xf32>
    %12 = arith.addf %9, %11 : vector<2x4xf32>
    %cst_11 = arith.constant dense<0xFF800000> : vector<2xf32>
    %13 = vector.multi_reduction <maximumf>, %12, %cst_11 [1] : vector<2x4xf32> to vector<2xf32>
    %14 = vector.shape_cast %13 : vector<2xf32> to vector<2x1xf32>
    %15 = vector.broadcast %14 : vector<2x1xf32> to vector<2x4xf32>
    %16 = arith.subf %12, %15 : vector<2x4xf32>
    %17 = math.exp %16 : vector<2x4xf32>
    %cst_12 = arith.constant dense<0.000000e+00> : vector<2xf32>
    %18 = vector.multi_reduction <add>, %17, %cst_12 [1] : vector<2x4xf32> to vector<2xf32>
    %19 = vector.shape_cast %18 : vector<2xf32> to vector<2x1xf32>
    %20 = tpu.reciprocal %19 {approx = true} : vector<2x1xf32> -> vector<2x1xf32>
    %21 = arith.mulf %19, %20 : vector<2x1xf32>
    %cst_13 = arith.constant 2.000000e+00 : f32
    %22 = vector.broadcast %cst_13 : f32 to vector<2x1xf32>
    %23 = arith.subf %22, %21 : vector<2x1xf32>
    %24 = arith.mulf %20, %23 : vector<2x1xf32>
    %25 = vector.broadcast %24 : vector<2x1xf32> to vector<2x4xf32>
    %26 = arith.mulf %17, %25 : vector<2x4xf32>
    %c0_14 = arith.constant 0 : index
    %c0_15 = arith.constant 0 : index
    %27 = vector.load %arg7[%c0_14, %c0_15] : memref<2x4xf32, #tpu.memory_space<vmem>>, vector<2x4xf32>
    %c0_16 = arith.constant 0 : index
    %c0_17 = arith.constant 0 : index
    %28 = vector.load %arg6[%c0_16, %c0_17] : memref<4x4xf32, #tpu.memory_space<vmem>>, vector<4x4xf32>
    %cst_18 = arith.constant dense<0.000000e+00> : vector<2x4xf32>
    %29 = tpu.matmul %27, %28, %cst_18 {dimension_numbers = #tpu.dot_dimension_numbers<[1], [0], [0], [1], [0, 0, 1, 1], [], []>} : vector<2x4xf32>, vector<4x4xf32>, vector<2x4xf32> -> vector<2x4xf32>
    %30 = arith.mulf %29, %26 : vector<2x4xf32>
    %cst_19 = arith.constant dense<0.000000e+00> : vector<2xf32>
    %31 = vector.multi_reduction <add>, %30, %cst_19 [1] : vector<2x4xf32> to vector<2xf32>
    %32 = vector.shape_cast %31 : vector<2xf32> to vector<2x1xf32>
    %33 = tpu.reciprocal %32 {approx = true} : vector<2x1xf32> -> vector<2x1xf32>
    %34 = arith.mulf %32, %33 : vector<2x1xf32>
    %cst_20 = arith.constant 2.000000e+00 : f32
    %35 = vector.broadcast %cst_20 : f32 to vector<2x1xf32>
    %36 = arith.subf %35, %34 : vector<2x1xf32>
    %37 = arith.mulf %33, %36 : vector<2x1xf32>
    %38 = vector.broadcast %37 : vector<2x1xf32> to vector<2x4xf32>
    %39 = arith.mulf %30, %38 : vector<2x4xf32>
    %40 = tpu.concatenate %26, %39 in 1 : vector<2x4xf32>, vector<2x4xf32> -> vector<2x8xf32>
    %c0_21 = arith.constant 0 : index
    %c0_22 = arith.constant 0 : index
    %41 = vector.load %arg8[%c0_21, %c0_22] : memref<2x8xf32, #tpu.memory_space<vmem>>, vector<2x8xf32>
    tpu.vector_store %arg8[%c0_21, %c0_22], %40 {strides = array<i32>} : memref<2x8xf32, #tpu.memory_space<vmem>>, vector<2x8xf32>,
    return
  }
  func.func @transform_0(%arg0: i32) -> (i32, i32) {
    %c0_i32 = arith.constant 0 : i32
    %c0_i32_0 = arith.constant 0 : i32
    return %arg0, %c0_i32 : i32, i32
  }
  func.func @transform_1(%arg0: i32) -> (i32, i32) {
    %c0_i32 = arith.constant 0 : i32
    %c0_i32_0 = arith.constant 0 : i32
    %c0_i32_1 = arith.constant 0 : i32
    return %c0_i32, %c0_i32_0 : i32, i32
  }
  func.func @transform_2(%arg0: i32) -> (i32, i32) {
    %c0_i32 = arith.constant 0 : i32
    %c0_i32_0 = arith.constant 0 : i32
    %c0_i32_1 = arith.constant 0 : i32
    return %c0_i32, %c0_i32_0 : i32, i32
  }
  func.func @transform_3(%arg0: i32) -> (i32, i32) {
    %c0_i32 = arith.constant 0 : i32
    %c0_i32_0 = arith.constant 0 : i32
    %c0_i32_1 = arith.constant 0 : i32
    return %c0_i32, %c0_i32_0 : i32, i32
  }
  func.func @transform_4(%arg0: i32) -> (i32, i32) {
    %c0_i32 = arith.constant 0 : i32
    %c0_i32_0 = arith.constant 0 : i32
    %c0_i32_1 = arith.constant 0 : i32
    return %c0_i32, %c0_i32_0 : i32, i32
  }
  func.func @transform_5(%arg0: i32) -> (i32, i32) {
    %c0_i32 = arith.constant 0 : i32
    %c0_i32_0 = arith.constant 0 : i32
    %c0_i32_1 = arith.constant 0 : i32
    return %c0_i32, %c0_i32_0 : i32, i32
  }
  func.func @transform_6(%arg0: i32) -> (i32, i32) {
    %c0_i32 = arith.constant 0 : i32
    %c0_i32_0 = arith.constant 0 : i32
    return %arg0, %c0_i32 : i32, i32
  }
  func.func @transform_7(%arg0: i32) -> (i32, i32) {
    %c0_i32 = arith.constant 0 : i32
    %c0_i32_0 = arith.constant 0 : i32
    return %arg0, %c0_i32 : i32, i32
  }
}

</mosaic_0001>

<bundles_post_ra>
// kernel: tpu_custom_call.1
= control target key start
LH: loop header
LB: loop body
LE: loop exit
PB: predicated region body
PF: predicated region fallthrough
CT: control target
= control target key end

     0   :  { %12 = vsyncpa [#allocation3], 0  ;;  %s384_s0 = inlined_call_operand.hbm [shape: f32[2,32], index: 0, kind: input, shape index: {}]   ;;  %s385_s1 = inlined_call_operand.vmem [shape: f32[32,32], index: 1, kind: input, shape index: {}]   ;;  %s386_s2 = inlined_call_operand.hbm [shape: f32[1,32], index: 2, kind: input, shape index: {}]   ;;  %s387_s3 = inlined_call_operand.vmem [shape: f32[32,4], index: 3, kind: input, shape index: {}]   ;;  %s388_s4 = inlined_call_operand.vmem [shape: f32[1,4], index: 4, kind: input, shape index: {}]   ;;  %s389_s5 = inlined_call_operand.vmem [shape: f32[4,4], index: 5, kind: input, shape index: {}]   ;;  %s390_s6 = inlined_call_operand.vmem [shape: f32[2,4], index: 6, kind: input, shape index: {}]   ;;  %s391_s7 = inlined_call_operand.hbm [shape: f32[2,8], index: 7, kind: output, shape index: {}]  }
   0x1   :  { %13 = vsyncpa [#allocation6], 0 }
   0x2   :  { %14 = vsyncpa [#allocation4], 0  ;;  %s20_s26 = sshll.u32 %s384_s0, 4  ;;  %s293_s27 = smov [#allocation2]   ;;  %s21_s26 = int_to_ptr.hbm [resolvable:$true] %s20_s26 }
   0x3   :  { %s22_s28 = sshll.u32 %s293_s27, 4  ;;  %s33_s8 = sshll.u32 %s386_s2, 4  ;;  %s23_s28 = int_to_ptr.vmem [resolvable:$true] %s22_s28  ;;  %s34_s8 = int_to_ptr.hbm [resolvable:$true] %s33_s8 }
   0x4   :  { %25 = dma.hbm_to_vmem [thread:$0]  %s21_s26, 32, %s23_s28, [#allocation3]  }
   0x5   :  { %s294_s9 = smov [#allocation5]  }
   0x6   :  { %s35_s10 = sshll.u32 %s294_s9, 4  ;;  %s36_s10 = int_to_ptr.vmem [resolvable:$true] %s35_s10 }
   0x7   :  { %38 = dma.hbm_to_vmem [thread:$0]  %s34_s8, 16, %s36_s10, [#allocation6]  }
   0x8   :  { %287 = dma.done.wait [#allocation3], 32  }
   0x9   :  { %288 = vsyncadd [#allocation3], 4294967264 }
   0xa   :  { %289 = dma.done.wait [#allocation6], 16  }
   0xb   :  { %290 = vsyncadd [#allocation6], 4294967280  ;;  %v59_v0 = vld [vmem:[%s385_s1 + $0x18] sm:$0xff]  ;;  %v58_v1 = vld [vmem:[%s385_s1 + $0x10] sm:$0xff]  ;;  %vm64_vm0 = vcmask 261120   ;;  %vm120_vm1 = vcmask 25600  }
   0xc   :  { %80 = vmatpush.msra.mxu0 %v59_v0  ;;  %v92_v2 = vld [vmem:[%s387_s3 + $0x18] sm:$0xff]  ;;  %v57_v3 = vld [vmem:[%s385_s1 + $0x8] sm:$0xff]  ;;  %v56_v4 = vld [vmem:[%s385_s1] sm:$0xff]  ;;  %vm141_vm2 = vcmask 1043456   ;;  %vm137_vm3 = vcmask 31744   ;;  %s188_s8 = sshll.u32 %s391_s7, 4  ;;  %s189_s8 = int_to_ptr.hbm [resolvable:$true] %s188_s8 }
   0xd   :  { %112 = vmatpush.msra.mxu1 %v92_v2  ;;  %v55_v5 = vld [vmem:[#allocation2] sm:$0x3]  ;;  %v91_v6 = vld [vmem:[%s387_s3 + $0x10] sm:$0xff]  ;;  %v90_v7 = vld [vmem:[%s387_s3 + $0x8] sm:$0xff]  ;;  %vm179_vm4 = vcmask 58368  }
   0xe   :  { %81 = vmatpush.msra.mxu0 %v58_v1  ;;  %v89_v8 = vld [vmem:[%s387_s3] sm:$0xff] }
   0xf   :  { %113 = vmatpush.msra.mxu1 %v91_v6  ;;  %v207_v9 = vld [vmem:[#allocation5] ss:$0 sm:$0xff]  ;;  %v208_v13 = vld [vmem:[%s388_s4] ss:$0 sm:$0xff]  ;;  %s295_s4 = smov 4  }
  0x10   :  { %82 = vmatpush.msra.mxu0 %v57_v3  ;;  %v136_v17 = vld [vmem:[%s389_s5] sm:$0xf]  ;;  %s296_s5 = smov [#allocation7]  }
  0x11   :  { %114 = vmatpush.msra.mxu1 %v90_v7  ;;  %v135_v18 = vld [vmem:[%s390_s6] sm:$0x3]  ;;  %201 = vmatpush.msk.msra.mxu2 %vm141_vm2, %v136_v17  ;;  %s186_s6 = sshll.u32 %s296_s5, 4  ;;  %s187_s6 = int_to_ptr.vmem [resolvable:$true] %s186_s6 }
  0x12   :  { %83 = vmatpush.msra.mxu0 %v56_v4  ;;  %202 = vmatmul.msk.f32.vlgmr.msra.gmra.mxu2 %vm137_vm3, %v135_v18 }
  0x13   :  { %199 = vmatmul.msk.f32.vlgmr.msra.gmra.mxu0 %vm64_vm0, %v55_v5  ;;  %115 = vmatpush.msra.mxu1 %v89_v8 }
  0x90   :  { %v85_v10 = vpop.f32.mrf.mxu0 }
  0x91   :  { %v86_v11 = vadd.f32 %v207_v9, %v85_v10 }
  0x93   :  { %v88_v12 = vmax.f32 %v86_v11, 0.0 }
  0x95   :  { %200 = vmatmul.msk.f32.vlgmr.msra.gmra.mxu1 %vm64_vm0, %v88_v12  ;;  %v162_v29 = vpop.f32.mrf.mxu2 }
 0x112   :  { %v117_v14 = vpop.f32.mrf.mxu1 }
 0x113   :  { %v118_v15 = vadd.f32 %v208_v13, %v117_v14 }
 0x115   :  { %v121_v16 = vsel %vm120_vm1, %v118_v15, -inf }
 0x116   :  { %122 = vmax.xlane.f32.xlu0 %v121_v16 }
 0x189   :  { %v123_v19 = vpop.xlane.xlu0 %122 }
 0x18a   :  { %v124_v20 = vsub.f32 %v118_v15, %v123_v19 }
 0x18c   :  { %v125_v21 = vmul.f32 1.442695, %v124_v20 }
 0x18e   :  { %209 = vpow2.f32 %v125_v21 }
 0x194   :  { %v210_v22 = vpop.eup %209 }
 0x195   :  { %v127_v23 = vsel %vm120_vm1, %v210_v22, 0.0 }
 0x196   :  { %128 = vadd.xlane.f32.xlu0 %v127_v23 }
 0x209   :  { %v129_v24 = vpop.xlane.xlu0 %128 }
 0x20a   :  { %211 = vrcp.f32 %v129_v24 }
 0x210   :  { %v212_v25 = vpop.eup %211 }
 0x211   :  { %v131_v26 = vmul.f32 %v212_v25, %v129_v24 }
 0x213   :  { %v132_v27 = vsub.f32 2.0, %v131_v26 }
 0x215   :  { %v133_v28 = vmul.f32 %v212_v25, %v132_v27 }
 0x217   :  { %v134_v30 = vmul.f32 %v210_v22, %v133_v28 }
 0x219   :  { %v165_v31 = vmul.f32 %v162_v29, %v134_v30 }
 0x21b   :  { %v166_v32 = vsel %vm120_vm1, %v165_v31, 0.0 }
 0x21c   :  { %167 = vadd.xlane.f32.xlu1 %v166_v32 }
 0x28f   :  { %v168_v33 = vpop.xlane.xlu1 %167 }
 0x290   :  { %213 = vrcp.f32 %v168_v33 }
 0x296   :  { %v214_v34 = vpop.eup %213 }
 0x297   :  { %v170_v35 = vmul.f32 %v214_v34, %v168_v33 }
 0x299   :  { %v171_v36 = vsub.f32 2.0, %v170_v35 }
 0x29b   :  { %v172_v37 = vmul.f32 %v214_v34, %v171_v36 }
 0x29d   :  { %v173_v38 = vmul.f32 %v172_v37, %v165_v31 }
 0x29f   :  { %175 = vrot.lane.b32.xlu1 %v173_v38, %s295_s4 }
 0x311   :  { %v176_v39 = vpop.permute.xlu1 %175 }
 0x312   :  { %v178_v40 = vsel %vm137_vm3, %v134_v30, %v176_v39 }
 0x313   :  { %180 = vst.msk [vmem:[#allocation7] sm:$0x3] %vm179_vm4, %v178_v40 }
 0x314   :  { %191 = dma.vmem_to_hbm [thread:$0]  %s187_s6, 32, %s189_s8, [#allocation4]  }
 0x315   :  { %291 = dma.done.wait [#allocation4], 32  }
 0x316   :  { %292 = vsyncadd [#allocation4], 4294967264 }
 0x317   :  { %196 = vsyncpa [#allocation3], 1 }
 0x318   :  { %197 = vsyncpa [#allocation6], 1 }
 0x319   :  { %198 = vsyncpa [#allocation4], 1 }

</bundles_post_ra>
